<compile_context>
chip_gen: v7x
topology: tpu7x:2x2x1
jax: 0.10.0
libtpu: 0.0.40
codegen_flags: <defaults>
</compile_context>

<pallas_src>
import functools

import jax
import jax.numpy as jnp
from jax.experimental import pallas as pl
from jax.experimental.pallas import tpu as pltpu


def _conv_bn_silu_kernel(w_ref, scale_ref, bias_ref, x_ref, o_ref):
    """One (batch, spatial-tile) step: out = SiLU(scale * (W @ Xcol) + bias)."""
    w = w_ref[...]                      # (C2, Kp)        f32
    xcol = x_ref[0]                     # (Kp, TILE_P)    f32
    # KxK conv as an MXU matmul over the (C1*k*k) contraction dim.
    acc = jnp.dot(w, xcol,
                  preferred_element_type=jnp.float32,
                  precision=jax.lax.Precision.HIGHEST)    # (C2, TILE_P)
    # Fused BatchNorm (per-channel affine) + SiLU epilogue on the f32 tile.
    y = acc * scale_ref[...] + bias_ref[...]
    y = y * (1.0 / (1.0 + jnp.exp(-y)))                   # SiLU = x * sigmoid(x)
    o_ref[0] = y.astype(o_ref.dtype)


def _im2col(x, k, s, pad):
    """(N, C, H, W) -> (N, C*k*k, Ho, Wo); patch dim ordered (c, kh, kw)."""
    n, c, h, w = x.shape
    xp = jnp.pad(x, ((0, 0), (0, 0), (pad, pad), (pad, pad)))
    ho = (h + 2 * pad - k) // s + 1
    wo = (w + 2 * pad - k) // s + 1
    cols = []
    for kh in range(k):
        for kw in range(k):
            cols.append(xp[:, :, kh:kh + s * ho:s, kw:kw + s * wo:s])
    col = jnp.stack(cols, axis=1)            # (N, k*k, C, Ho, Wo)
    col = col.transpose(0, 2, 1, 3, 4)       # (N, C, k*k, Ho, Wo)
    return col.reshape(n, c * k * k, ho, wo), ho, wo


@functools.partial(jax.jit,
                   static_argnames=("k", "s", "dilation", "eps", "max_tile_p"))
def dilation_conv_forward(x, w, gamma, beta, running_mean, running_var, *,
                          k=1, s=1, dilation=1, eps=1e-3, max_tile_p=2048):
    """Forward of DilationConv: SiLU(BN(Conv2d(x, w, stride=s, padding=dilation)))."""
    n, c1, _h, _w = x.shape
    c2 = w.shape[0]
    pad = dilation  # nn.Conv2d(c1, c2, k, s, dilation): 5th positional arg is padding.

    # im2col (for the default k=1 this is just the spatial zero-pad + reshape).
    xcol, ho, wo = _im2col(x.astype(jnp.float32), k, s, pad)   # (N, K, Ho, Wo)
    kdim = c1 * k * k
    p_total = ho * wo
    xcol = xcol.reshape(n, kdim, p_total)

    # Fold eval-mode BatchNorm (running stats) into per-channel scale/bias.
    # TODO(synk): training-mode BN (batch statistics + running-stat update) not implemented.
    scale = (gamma / jnp.sqrt(running_var + eps)).astype(jnp.float32)
    bias = (beta.astype(jnp.float32) - running_mean.astype(jnp.float32) * scale)

    # --- TPU tiling --------------------------------------------------------
    # Pad the contraction dim to a sublane multiple (zeros don't change the dot)
    # and the spatial dim to a lane-dense multiple of 128 so stores are long
    # unmasked vst streams; tiles up to `max_tile_p` lanes keep VMEM use small
    # on all of v5e / v6e / v7x while staying well above the per-step overhead.
    kp = max(8, ((kdim + 7) // 8) * 8)
    lane = 128
    p_pad = pl.cdiv(p_total, lane) * lane
    tile_p = min(p_pad, max_tile_p)
    p_pad = pl.cdiv(p_pad, tile_p) * tile_p

    xcol = jnp.pad(xcol, ((0, 0), (0, kp - kdim), (0, p_pad - p_total)))
    w2 = jnp.pad(w.reshape(c2, kdim).astype(jnp.float32), ((0, 0), (0, kp - kdim)))
    scale2 = scale.reshape(c2, 1)
    bias2 = bias.reshape(c2, 1)

    grid = (n, p_pad // tile_p)
    out = pl.pallas_call(
        _conv_bn_silu_kernel,
        out_shape=jax.ShapeDtypeStruct((n, c2, p_pad), x.dtype),
        grid=grid,
        in_specs=[
            pl.BlockSpec((c2, kp), lambda b, p: (0, 0)),        # conv weights
            pl.BlockSpec((c2, 1), lambda b, p: (0, 0)),         # fused BN scale
            pl.BlockSpec((c2, 1), lambda b, p: (0, 0)),         # fused BN bias
            pl.BlockSpec((1, kp, tile_p), lambda b, p: (b, 0, p)),
        ],
        out_specs=pl.BlockSpec((1, c2, tile_p), lambda b, p: (b, 0, p)),
        compiler_params=pltpu.CompilerParams(
            dimension_semantics=("parallel", "parallel")),
    )(w2, scale2, bias2, xcol)

    return out[:, :, :p_total].reshape(n, c2, ho, wo)


def _reference(x, w, gamma, beta, mean, var, *, k, s, dilation, eps):
    pad = dilation
    out = jax.lax.conv_general_dilated(
        x, w, window_strides=(s, s), padding=[(pad, pad), (pad, pad)],
        dimension_numbers=("NCHW", "OIHW", "NCHW"),
        precision=jax.lax.Precision.HIGHEST)
    scale = gamma / jnp.sqrt(var + eps)
    bias = beta - mean * scale
    out = out * scale[None, :, None, None] + bias[None, :, None, None]
    return out * jax.nn.sigmoid(out)


if __name__ == "__main__":
    key = jax.random.PRNGKey(0)
    kx, kw, kg, kb, km, kv = jax.random.split(key, 6)

    N, C1, H, W = 2, 4, 16, 16
    C2, K, S, DIL = 8, 1, 1, 1   # module defaults: k=1, s=1, dilation(=padding)=1

    x = jax.random.normal(kx, (N, C1, H, W), dtype=jnp.float32)
    w = 0.2 * jax.random.normal(kw, (C2, C1, K, K), dtype=jnp.float32)
    gamma = 1.0 + 0.1 * jax.random.normal(kg, (C2,), dtype=jnp.float32)
    beta = 0.1 * jax.random.normal(kb, (C2,), dtype=jnp.float32)
    running_mean = 0.1 * jax.random.normal(km, (C2,), dtype=jnp.float32)
    running_var = jnp.abs(jax.random.normal(kv, (C2,), dtype=jnp.float32)) + 0.5

    y = dilation_conv_forward(x, w, gamma, beta, running_mean, running_var,
                              k=K, s=S, dilation=DIL, eps=1e-3)
    y = jax.block_until_ready(y)

    y_ref = _reference(x, w, gamma, beta, running_mean, running_var,
                       k=K, s=S, dilation=DIL, eps=1e-3)

    assert y.shape == y_ref.shape == (N, C2, H + 2 * DIL, W + 2 * DIL), y.shape
    assert y.dtype == x.dtype
    assert jnp.allclose(y, y_ref, atol=1e-4, rtol=1e-4), \
        float(jnp.max(jnp.abs(y - y_ref)))

    print("KERNEL_OK")
</pallas_src>

<mosaic_0001>
module attributes {stable_mosaic.version = 11 : i64} {
  func.func @_conv_bn_silu_kernel(%arg0: i32, %arg1: i32, %arg2: memref<8x8xf32, #tpu.memory_space<vmem>>, %arg3: memref<8x1xf32, #tpu.memory_space<vmem>>, %arg4: memref<8x1xf32, #tpu.memory_space<vmem>>, %arg5: memref<1x8x384xf32, #tpu.memory_space<vmem>>, %arg6: memref<1x8x384xf32, #tpu.memory_space<vmem>>) attributes {dimension_semantics = [#tpu.dimension_semantics<parallel>, #tpu.dimension_semantics<parallel>], iteration_bounds = array<i64: 2, 1>, scalar_prefetch = 0 : i64, scratch_operands = 0 : i64, tpu.core_type = #tpu.core_type<tc>, window_params = [{pipeline_mode = #tpu.pipeline_mode<synchronous>, transform_indices = @transform_0, window_bounds = array<i64: 8, 8>}, {pipeline_mode = #tpu.pipeline_mode<synchronous>, transform_indices = @transform_1, window_bounds = array<i64: 8, 1>}, {pipeline_mode = #tpu.pipeline_mode<synchronous>, transform_indices = @transform_2, window_bounds = array<i64: 8, 1>}, {transform_indices = @transform_3, window_bounds = array<i64: 1, 8, 384>}, {transform_indices = @transform_4, window_bounds = array<i64: 1, 8, 384>}]} {
    %c0 = arith.constant 0 : index
    %c0_0 = arith.constant 0 : index
    %0 = vector.load %arg2[%c0, %c0_0] : memref<8x8xf32, #tpu.memory_space<vmem>>, vector<8x8xf32>
    %c0_1 = arith.constant 0 : index
    %c0_2 = arith.constant 0 : index
    %c0_3 = arith.constant 0 : index
    %1 = vector.load %arg5[%c0_1, %c0_2, %c0_3] : memref<1x8x384xf32, #tpu.memory_space<vmem>>, vector<1x8x384xf32>
    %2 = vector.shape_cast %1 : vector<1x8x384xf32> to vector<8x384xf32>
    %cst = arith.constant dense<0.000000e+00> : vector<8x384xf32>
    %3 = tpu.matmul %0, %2, %cst {dimension_numbers = #tpu.dot_dimension_numbers<[1], [0], [0], [1], [0, 0, 1, 1], [], []>, precision = #tpu.contract_precision<fp32>} : vector<8x8xf32>, vector<8x384xf32>, vector<8x384xf32> -> vector<8x384xf32>
    %c0_4 = arith.constant 0 : index
    %c0_5 = arith.constant 0 : index
    %4 = vector.load %arg3[%c0_4, %c0_5] : memref<8x1xf32, #tpu.memory_space<vmem>>, vector<8x1xf32>
    %5 = vector.broadcast %4 : vector<8x1xf32> to vector<8x384xf32>
    %6 = arith.mulf %3, %5 : vector<8x384xf32>
    %c0_6 = arith.constant 0 : index
    %c0_7 = arith.constant 0 : index
    %7 = vector.load %arg4[%c0_6, %c0_7] : memref<8x1xf32, #tpu.memory_space<vmem>>, vector<8x1xf32>
    %8 = vector.broadcast %7 : vector<8x1xf32> to vector<8x384xf32>
    %9 = arith.addf %6, %8 : vector<8x384xf32>
    %cst_8 = arith.constant 0.000000e+00 : f32
    %10 = vector.broadcast %cst_8 : f32 to vector<8x384xf32>
    %11 = arith.subf %10, %9 : vector<8x384xf32>
    %12 = math.exp %11 : vector<8x384xf32>
    %cst_9 = arith.constant 1.000000e+00 : f32
    %13 = vector.broadcast %cst_9 : f32 to vector<8x384xf32>
    %14 = arith.addf %13, %12 : vector<8x384xf32>
    %cst_10 = arith.constant 1.000000e+00 : f32
    %15 = vector.broadcast %cst_10 : f32 to vector<8x384xf32>
    %16 = arith.divf %15, %14 : vector<8x384xf32>
    %17 = arith.mulf %9, %16 : vector<8x384xf32>
    %c0_11 = arith.constant 0 : index
    %c0_12 = arith.constant 0 : index
    %c0_13 = arith.constant 0 : index
    %18 = vector.load %arg6[%c0_11, %c0_12, %c0_13] : memref<1x8x384xf32, #tpu.memory_space<vmem>>, vector<1x8x384xf32>
    %19 = vector.shape_cast %18 : vector<1x8x384xf32> to vector<8x384xf32>
    %20 = vector.shape_cast %17 : vector<8x384xf32> to vector<1x8x384xf32>
    tpu.vector_store %arg6[%c0_11, %c0_12, %c0_13], %20 {strides = array<i32>} : memref<1x8x384xf32, #tpu.memory_space<vmem>>, vector<1x8x384xf32>,
    return
  }
  func.func @transform_0(%arg0: i32, %arg1: i32) -> (i32, i32) {
    %c0_i32 = arith.constant 0 : i32
    %c0_i32_0 = arith.constant 0 : i32
    %c0_i32_1 = arith.constant 0 : i32
    return %c0_i32, %c0_i32_0 : i32, i32
  }
  func.func @transform_1(%arg0: i32, %arg1: i32) -> (i32, i32) {
    %c0_i32 = arith.constant 0 : i32
    %c0_i32_0 = arith.constant 0 : i32
    %c0_i32_1 = arith.constant 0 : i32
    return %c0_i32, %c0_i32_0 : i32, i32
  }
  func.func @transform_2(%arg0: i32, %arg1: i32) -> (i32, i32) {
    %c0_i32 = arith.constant 0 : i32
    %c0_i32_0 = arith.constant 0 : i32
    %c0_i32_1 = arith.constant 0 : i32
    return %c0_i32, %c0_i32_0 : i32, i32
  }
  func.func @transform_3(%arg0: i32, %arg1: i32) -> (i32, i32, i32) {
    %c0_i32 = arith.constant 0 : i32
    %c0_i32_0 = arith.constant 0 : i32
    return %arg0, %c0_i32, %arg1 : i32, i32, i32
  }
  func.func @transform_4(%arg0: i32, %arg1: i32) -> (i32, i32, i32) {
    %c0_i32 = arith.constant 0 : i32
    %c0_i32_0 = arith.constant 0 : i32
    return %arg0, %c0_i32, %arg1 : i32, i32, i32
  }
}

</mosaic_0001>

<bundles_post_ra>
// kernel: dilation_conv_forward.1
= control target key start
LH: loop header
LB: loop body
LE: loop exit
PB: predicated region body
PF: predicated region fallthrough
CT: control target
= control target key end

     0   :  { %s1449_s15 = smov 0   ;;  %s1451_s16 = smov 0   ;;  %s1531_s0 = inlined_call_operand.vmem [shape: f32[8,8], index: 0, kind: input, shape index: {}]   ;;  %s1532_s1 = inlined_call_operand.vmem [shape: f32[8,1], index: 1, kind: input, shape index: {}]   ;;  %s1533_s2 = inlined_call_operand.vmem [shape: f32[8,1], index: 2, kind: input, shape index: {}]   ;;  %s1534_s3 = inlined_call_operand.vmem [shape: f32[2,8,384], index: 3, kind: input, shape index: {}]   ;;  %s1535_s4 = inlined_call_operand.vmem [shape: f32[2,8,384], index: 4, kind: output, shape index: {}]  }
   0x1   :  { %s1453_s17 = smov 0  }
   0x2 LB: > { %s26_s18 = sadd.s32 1, %s1415_s16  ;;  %p1289_p0 = scmp.ge.s32.totalorder %s1419_s17, 1  ;;  %s1419_s17 = sphi %s1453_s17, %s14_s17   ;;  %s1415_s16 = sphi %s1451_s16, %s1537_s16   ;;  %s1411_s15 = sphi %s1449_s15, %s1536_s15  }
   0x3   : > { %p28_p1 = scmp.ge.s32.totalorder %s26_s18, 2  ;;  %p183_p2 = scmp.lt.s32.totalorder %s1419_s17, 3 }
   0x5   : > { %s1539_s18 = smov (%p28_p1, %s26_s18), 0  ;;  %p184_p3 = pnand %p1289_p0, %p183_p2 }
   0x6   : > { %p218_p4 = scmp.lt.s32.totalorder (!%p184_p3), %s1411_s15, 1  ;;  %v237_v0 = vld [vmem:[%s1531_s0] sm:$0xff] (!%p184_p3)  ;;  %vm241_vm0 = vcmask (!%p184_p3), 64512   ;;  %v1421_v1 = vmov (!%p184_p3), 0.0   ;;  %vm1422_vm1 = vmmov (!%p184_p3), 0   ;;  %v1423_v5 = vmov (!%p184_p3), 0  }
   0x7   : > { %187 = sbr.rel (%p184_p3) target bundleno = 312 (0x138), region = 36  ;;  %1306 = vmatprep.subr.mxu1 (!%p184_p3), %v1421_v1  ;;  %311 = vmatprep.mubr.f32.mxu0 (!%p184_p3), %v1421_v1  ;;  %v243_v2 = vsel (!%p184_p3), %vm241_vm0, %v237_v0, 0  ;;  %v1156_v3 = vld [vmem:[%s1532_s1] sm:$0xff] (!%p184_p3) }
   0x8   : > { %1308 = vmatprep.mubr.msk.f32.mxu1 (!%p184_p3), %vm1422_vm1, %v1421_v1  ;;  %v1479_v4 = vand.u32 (!%p184_p3), 4294901760, %v243_v2  ;;  %1384 = vset.pattern.permute.xlu0 (!%p184_p3), %v1423_v5  ;;  %v1165_v7 = vld [vmem:[%s1533_s2] sm:$0xff] (!%p184_p3) }
   0x9   : > { %1159 = vperm.xlu0 (!%p184_p3), %1384, %v1156_v3  }
   0xa   : > { %v313_v6 = vsub.f32 (!%p184_p3), %v243_v2, %v1479_v4 }
   0xc   : > { %v314_v8 = vand.u32 (!%p184_p3), 4294901760, %v313_v6 }
   0xd   : > { %1168 = vperm.xlu0 (!%p184_p3), %1384, %v1165_v7  }
   0xe   : > { %s1541_s15 = smov (!%p218_p4, %s1411_s15), 1  ;;  %v315_v15 = vsub.f32 %v313_v6, %v314_v8 }
   0xf   : > { %s1356_s23 = smul.u32 24, %s1541_s15 }
  0x10   : > { %v316_v18 = vand.u32 4294901760, %v315_v15 }
  0x11   : > { %s225_s28 = scalar_lea.vmem %s1534_s3, %s1356_s23  ;;  %s235_s5 = scalar_lea.vmem %s1535_s4, %s1356_s23 }
  0x12   : > { %v239_v9 = vld [vmem:[%s225_s28 + $0x8] sm:$0xff]  ;;  %v238_v10 = vld [vmem:[%s225_s28] sm:$0xff]  ;;  %v240_v11 = vld [vmem:[%s225_s28 + $0x10] sm:$0xff] }
  0x13   : > { %v245_v12 = vand.u32 4294901760, %v239_v9  ;;  %v247_v13 = vand.u32 4294901760, %v238_v10  ;;  %v711_v14 = vand.u32 4294901760, %v240_v11 }
  0x15   : > { %246 = vmatprep.subr.mxu0 %v245_v12  ;;  %v330_v16 = vsub.f32 %v238_v10, %v247_v13  ;;  %1307 = vmatpush3.msra.mxu1 %v711_v14  ;;  %v788_v17 = vsub.f32 %v240_v11, %v711_v14  ;;  %v324_v19 = vsub.f32 %v239_v9, %v245_v12 }
  0x16   : > { %248 = vmatpush1.msra.mxu0 %v247_v13  ;;  %1311 = vmatprep.subr.mxu1 %v1421_v1 }
  0x17   : > { %317 = vmatmul.mubr.f32.vlgmr.msra.gmra.mrb[0].mxu0 %v316_v18  ;;  %1309 = vmatmul.mubr.f32.vlgmr.msra.gmra.mrb[0].mxu1 %v316_v18  ;;  %v325_v20 = vand.u32 4294901760, %v324_v19  ;;  %v331_v21 = vand.u32 4294901760, %v330_v16  ;;  %v789_v22 = vand.u32 4294901760, %v788_v17 }
  0x18   : > { %397 = vmatprep.mubr.f32.mxu0 %v1421_v1  ;;  %1313 = vmatprep.mubr.msk.f32.mxu1 %vm1422_vm1, %v1421_v1 }
  0x19   : > { %v326_v23 = vsub.f32 %v324_v19, %v325_v20  ;;  %v332_v24 = vsub.f32 %v330_v16, %v331_v21  ;;  %v790_v25 = vsub.f32 %v788_v17, %v789_v22 }
  0x1b   : > { %v327_v26 = vand.u32 4294901760, %v326_v23  ;;  %v333_v27 = vand.u32 4294901760, %v332_v24  ;;  %v791_v28 = vand.u32 4294901760, %v790_v25 }
  0x1d   : > { %328 = vmatprep.subr.mxu0 %v327_v26  ;;  %1312 = vmatpush3.msra.mxu1 %v791_v28 }
  0x1e   : > { %334 = vmatpush1.msra.mxu0 %v333_v27  ;;  %1316 = vmatprep.subr.mxu1 %v1421_v1 }
  0x1f   : > { %399 = vmatmul.mubr.f32.vlgmr.msra.gmra.mrb[0].mxu0 %v1479_v4  ;;  %1314 = vmatmul.mubr.f32.vlgmr.msra.gmra.mrb[0].mxu1 %v1479_v4 }
  0x20   : > { %407 = vmatprep.subr.mxu0 %v324_v19  ;;  %473 = vmatprep.mubr.f32.mxu0 %v1421_v1 }
  0x21   : > { %410 = vmatpush1.msra.mxu0 %v330_v16  ;;  %1317 = vmatpush3.msra.mxu1 %v788_v17 }
  0x22   : > { %1318 = vmatprep.mubr.msk.f32.mxu1 %vm1422_vm1, %v1421_v1  ;;  %483 = vmatprep.subr.mxu0 %v245_v12 }
  0x23   : > { %1321 = vmatprep.subr.mxu1 %v1421_v1 }
  0x27   : > { %476 = vmatmul.mubr.f32.vlgmr.msra.gmra.mrb[0].mxu0 %v313_v6  ;;  %1319 = vmatmul.mubr.f32.vlgmr.msra.gmra.mrb[0].mxu1 %v313_v6 }
  0x28   : > { %485 = vmatpush1.msra.mxu0 %v247_v13  ;;  %548 = vmatprep.mubr.f32.mxu0 %v1421_v1 }
  0x29   : > { %1322 = vmatpush3.msra.mxu1 %v711_v14  ;;  %1323 = vmatprep.mubr.msk.f32.mxu1 %vm1422_vm1, %v1421_v1 }
  0x2a   : > { %561 = vmatprep.subr.mxu0 %v325_v20  ;;  %1326 = vmatprep.subr.mxu1 %v1421_v1 }
  0x2f   : > { %552 = vmatmul.mubr.f32.vlgmr.msra.gmra.mrb[0].mxu0 %v314_v8  ;;  %1324 = vmatmul.mubr.f32.vlgmr.msra.gmra.mrb[0].mxu1 %v314_v8 }
  0x30   : > { %565 = vmatpush1.msra.mxu0 %v331_v21  ;;  %628 = vmatprep.mubr.f32.mxu0 %v1421_v1 }
  0x31   : > { %1327 = vmatpush3.msra.mxu1 %v789_v22  ;;  %1328 = vmatprep.mubr.msk.f32.mxu1 %vm1422_vm1, %v1421_v1 }
  0x32   : > { %637 = vmatprep.subr.mxu0 %v245_v12  ;;  %1331 = vmatprep.subr.mxu1 %v1421_v1 }
  0x37   : > { %630 = vmatmul.mubr.f32.vlgmr.msra.gmra.mrb[0].mxu0 %v1479_v4  ;;  %1329 = vmatmul.mubr.f32.vlgmr.msra.gmra.mrb[0].mxu1 %v1479_v4 }
  0x38   : > { %639 = vmatpush1.msra.mxu0 %v247_v13  ;;  %702 = vmatprep.mubr.f32.mxu0 %v1421_v1 }
  0x39   : > { %1332 = vmatpush3.msra.mxu1 %v711_v14  ;;  %1333 = vmatprep.mubr.msk.f32.mxu1 %vm1422_vm1, %v1421_v1 }
  0x3f   : > { %704 = vmatmul.mubr.f32.vlgmr.msra.gmra.mrb[0].mxu0 %v1479_v4  ;;  %1334 = vmatmul.mubr.f32.vlgmr.msra.gmra.mrb[0].mxu1 %v1479_v4 }
  0x88   : > { %v1160_v29 = vpop.permute.xlu0 %1159 }
  0x8c   : > { %v1169_v37 = vpop.permute.xlu0 %1168 }
 0x112   : > { %v705_v30 = vpop.f32.mrb[0].mxu0  ;;  %v1152_v31 = vpop.f32.mrb[0].mxu1 }
 0x113   : > { %v1162_v32 = vmul.f32 %v1160_v29, %v705_v30  ;;  %v1164_v33 = vmul.f32 %v1160_v29, %v1152_v31  ;;  %v707_v34 = vpop.f32.mrb[1].mxu0  ;;  %v1335_v35 = vpop.f32.mrb[1].mxu1 }
 0x114   : > { %v1163_v36 = vmul.f32 %v1160_v29, %v707_v34 }
 0x115   : > { %v1171_v38 = vadd.f32 %v1169_v37, %v1162_v32  ;;  %v1173_v39 = vadd.f32 %v1169_v37, %v1164_v33 }
 0x116   : > { %v1172_v40 = vadd.f32 %v1169_v37, %v1163_v36 }
 0x117   : > { %v1174_v41 = vsub.f32 0.0, %v1171_v38  ;;  %v1176_v42 = vsub.f32 0.0, %v1173_v39 }
 0x118   : > { %v1175_v43 = vsub.f32 0.0, %v1172_v40 }
 0x119   : > { %v1177_v44 = vmul.f32 1.442695, %v1174_v41  ;;  %v1181_v45 = vmul.f32 1.442695, %v1176_v42 }
 0x11a   : > { %v1179_v46 = vmul.f32 1.442695, %v1175_v43 }
 0x11b   : > { %1385 = vpow2.f32 %v1177_v44 }
 0x11c   : > { %1387 = vpow2.f32 %v1179_v46 }
 0x11d   : > { %1389 = vpow2.f32 %v1181_v45 }
 0x125   : > { %v1386_v47 = vpop.eup %1385 }
 0x126   : > { %v1388_v48 = vpop.eup %1387  ;;  %v1183_v49 = vadd.f32 1.0, %v1386_v47 }
 0x127   : > { %v1390_v50 = vpop.eup %1389  ;;  %v1184_v51 = vadd.f32 1.0, %v1388_v48 }
 0x128   : > { %v1185_v52 = vadd.f32 1.0, %v1390_v50  ;;  %1391 = vrcp.f32 %v1183_v49 }
 0x129   : > { %1393 = vrcp.f32 %v1184_v51 }
 0x12a   : > { %1395 = vrcp.f32 %v1185_v52 }
 0x132   : > { %v1392_v53 = vpop.eup %1391 }
 0x133   : > { %v1394_v54 = vpop.eup %1393  ;;  %v1192_v55 = vmul.f32 %v1392_v53, %v1171_v38 }
 0x134   : > { %v1396_v56 = vpop.eup %1395  ;;  %v1193_v57 = vmul.f32 %v1394_v54, %v1172_v40 }
 0x135   : > { %v1194_v58 = vmul.f32 %v1396_v56, %v1173_v39  ;;  %1195 = vst [vmem:[%s235_s5] sm:$0xff] %v1192_v55 }
 0x136   : > { %1196 = vst [vmem:[%s235_s5 + $0x8] sm:$0xff] %v1193_v57 }
 0x137   : > { %1197 = vst [vmem:[%s235_s5 + $0x10] sm:$0xff] %v1194_v58 }
 0x138 PF: > { %s14_s17 = sadd.s32 1, %s1419_s17   ;;  %s1536_s15 = smov %s1415_s16 }
 0x139   : > { %p11_p5 = scmp.ge.s32.totalorder %s14_s17, 4   ;;  %s1537_s16 = smov %s1539_s18 }
 0x13b   :  { %13 = sbr.rel (!%p11_p5) target bundleno = 2 (0x2), region = 66 }

</bundles_post_ra>
